<compile_context>
chip_gen: v7x
topology: tpu7x:2x2x1
jax: 0.10.0
libtpu: 0.0.40
codegen_flags: <defaults>
</compile_context>

<pallas_src>
import jax
import jax.numpy as jnp
from jax.experimental import pallas as pl
from jax.experimental.pallas import tpu as pltpu


def basicnn_kernel(params_ref, x_ref, o_ref):
    # params_ref lives in SMEM: [w00, b00, w01, w10, b10, w11, final_bias]
    w00 = params_ref[0]
    b00 = params_ref[1]
    w01 = params_ref[2]
    w10 = params_ref[3]
    b10 = params_ref[4]
    w11 = params_ref[5]
    final_bias = params_ref[6]

    # Math in f32 (matches PyTorch); store casts back to the output dtype.
    x = x_ref[...].astype(jnp.float32)

    r1 = jnp.maximum(x * w00 + b00, 0.0) * w01          # top "neuron"
    r2 = jnp.maximum(x * w10 + b10, 0.0) * w11          # bottom "neuron"
    out = jnp.maximum(r1 + r2 + final_bias, 0.0)         # final ReLU

    o_ref[...] = out.astype(o_ref.dtype)


def basic_nn_forward(x, params, *, max_tile_bytes=2 * 1024 * 1024):
    """x: f32 array of any shape; params: f32[7] (see kernel docstring)."""
    orig_shape = x.shape
    flat = x.reshape(-1)
    n = flat.shape[0]

    # Lane-dense layout: widest lane count that divides n (no pad/slice
    # copies needed); otherwise pad minimally to a multiple of 128.
    lanes = next((c for c in (1024, 512, 256, 128) if n % c == 0), None)
    padded = False
    if lanes is None:
        lanes = 128
        flat = jnp.pad(flat, (0, (-n) % lanes))
        padded = True
    x2d = flat.reshape(-1, lanes)
    rows = x2d.shape[0]

    # Tile rows: <= max_tile_bytes per tile. With Pallas' default 2-deep
    # pipelining (input + output) that is <= 4 * max_tile_bytes of VMEM,
    # safe on v5e / v6e / v7x without raising the scoped VMEM limit.
    bytes_per_row = lanes * x2d.dtype.itemsize
    tile_rows = max(1, max_tile_bytes // bytes_per_row)
    if tile_rows >= rows:
        tile_rows = rows                       # single full-extent block
    else:
        tile_rows = max(8, (tile_rows // 8) * 8)  # keep (8, 128) alignment

    grid = (pl.cdiv(rows, tile_rows),)  # partial tail block handled by Pallas

    out2d = pl.pallas_call(
        basicnn_kernel,
        out_shape=jax.ShapeDtypeStruct(x2d.shape, x2d.dtype),
        grid=grid,
        in_specs=[
            pl.BlockSpec(memory_space=pltpu.SMEM),               # scalar params
            pl.BlockSpec((tile_rows, lanes), lambda i: (i, 0)),  # streamed tile
        ],
        out_specs=pl.BlockSpec((tile_rows, lanes), lambda i: (i, 0)),
        compiler_params=pltpu.CompilerParams(
            dimension_semantics=("parallel",),  # lets v7x use both TensorCores
        ),
    )(params, x2d)

    out = out2d.reshape(-1)
    if padded:
        # Padded tail holds garbage (relu(b)*w + bias) by construction;
        # it is sliced off here and never exposed.
        out = out[:n]
    return out.reshape(orig_shape)


def basic_nn_reference(x, params):
    w00, b00, w01, w10, b10, w11, fb = [params[i] for i in range(7)]
    r1 = jnp.maximum(x * w00 + b00, 0.0) * w01
    r2 = jnp.maximum(x * w10 + b10, 0.0) * w11
    return jnp.maximum(r1 + r2 + fb, 0.0)


if __name__ == "__main__":
    # Deterministic parameters exactly matching the PyTorch __init__.
    params = jnp.array(
        [1.7, -0.85, -40.8, 12.6, 0.0, 2.7, -16.0], dtype=jnp.float32
    )

    key = jax.random.PRNGKey(0)
    k0, k1, k2 = jax.random.split(key, 3)

    # Primary small input (image-like tensor; elementwise op so shape is free).
    x = jax.random.uniform(k0, (2, 4, 16, 16), dtype=jnp.float32)
    out = jax.block_until_ready(basic_nn_forward(x, params))
    ref = basic_nn_reference(x, params)
    assert out.shape == x.shape and out.dtype == x.dtype
    assert jnp.allclose(out, ref, atol=1e-5, rtol=1e-5), "mismatch (primary)"

    # Ragged element count -> exercises the minimal-pad fallback path.
    x2 = jax.random.uniform(k1, (3, 5, 7), dtype=jnp.float32)
    out2 = jax.block_until_ready(basic_nn_forward(x2, params))
    assert jnp.allclose(out2, basic_nn_reference(x2, params),
                        atol=1e-5, rtol=1e-5), "mismatch (ragged)"

    # Multi-step grid with a partial tail block (tiny tile cap just for test).
    x3 = jax.random.uniform(k2, (100, 256), dtype=jnp.float32)  # 25 rows @ 1024 lanes
    out3 = jax.block_until_ready(
        basic_nn_forward(x3, params, max_tile_bytes=8 * 1024 * 4)  # 8-row tiles
    )
    assert jnp.allclose(out3, basic_nn_reference(x3, params),
                        atol=1e-5, rtol=1e-5), "mismatch (tiled grid)"

    print("KERNEL_OK")
</pallas_src>

<mosaic_0001>
module attributes {stable_mosaic.version = 11 : i64} {
  func.func @basicnn_kernel(%arg0: i32, %arg1: memref<7xf32, #tpu.memory_space<smem>>, %arg2: memref<2x1024xf32, #tpu.memory_space<vmem>>, %arg3: memref<2x1024xf32, #tpu.memory_space<vmem>>) attributes {dimension_semantics = [#tpu.dimension_semantics<parallel>], iteration_bounds = array<i64: 1>, scalar_prefetch = 0 : i64, scratch_operands = 0 : i64, tpu.core_type = #tpu.core_type<tc>, window_params = [{transform_indices = @transform_0, window_bounds = array<i64: 7>}, {transform_indices = @transform_1, window_bounds = array<i64: 2, 1024>}, {transform_indices = @transform_2, window_bounds = array<i64: 2, 1024>}]} {
    %c0 = arith.constant 0 : index
    %0 = memref.load %arg1[%c0] : memref<7xf32, #tpu.memory_space<smem>>
    %c1 = arith.constant 1 : index
    %1 = memref.load %arg1[%c1] : memref<7xf32, #tpu.memory_space<smem>>
    %c2 = arith.constant 2 : index
    %2 = memref.load %arg1[%c2] : memref<7xf32, #tpu.memory_space<smem>>
    %c3 = arith.constant 3 : index
    %3 = memref.load %arg1[%c3] : memref<7xf32, #tpu.memory_space<smem>>
    %c4 = arith.constant 4 : index
    %4 = memref.load %arg1[%c4] : memref<7xf32, #tpu.memory_space<smem>>
    %c5 = arith.constant 5 : index
    %5 = memref.load %arg1[%c5] : memref<7xf32, #tpu.memory_space<smem>>
    %c6 = arith.constant 6 : index
    %6 = memref.load %arg1[%c6] : memref<7xf32, #tpu.memory_space<smem>>
    %c0_0 = arith.constant 0 : index
    %c0_1 = arith.constant 0 : index
    %7 = vector.load %arg2[%c0_0, %c0_1] : memref<2x1024xf32, #tpu.memory_space<vmem>>, vector<2x1024xf32>
    %8 = vector.broadcast %0 : f32 to vector<2x1024xf32>
    %9 = arith.mulf %7, %8 : vector<2x1024xf32>
    %10 = vector.broadcast %1 : f32 to vector<2x1024xf32>
    %11 = arith.addf %9, %10 : vector<2x1024xf32>
    %cst = arith.constant 0.000000e+00 : f32
    %12 = vector.broadcast %cst : f32 to vector<2x1024xf32>
    %13 = arith.maximumf %11, %12 : vector<2x1024xf32>
    %14 = vector.broadcast %2 : f32 to vector<2x1024xf32>
    %15 = arith.mulf %13, %14 : vector<2x1024xf32>
    %16 = vector.broadcast %3 : f32 to vector<2x1024xf32>
    %17 = arith.mulf %7, %16 : vector<2x1024xf32>
    %18 = vector.broadcast %4 : f32 to vector<2x1024xf32>
    %19 = arith.addf %17, %18 : vector<2x1024xf32>
    %cst_2 = arith.constant 0.000000e+00 : f32
    %20 = vector.broadcast %cst_2 : f32 to vector<2x1024xf32>
    %21 = arith.maximumf %19, %20 : vector<2x1024xf32>
    %22 = vector.broadcast %5 : f32 to vector<2x1024xf32>
    %23 = arith.mulf %21, %22 : vector<2x1024xf32>
    %24 = arith.addf %15, %23 : vector<2x1024xf32>
    %25 = vector.broadcast %6 : f32 to vector<2x1024xf32>
    %26 = arith.addf %24, %25 : vector<2x1024xf32>
    %cst_3 = arith.constant 0.000000e+00 : f32
    %27 = vector.broadcast %cst_3 : f32 to vector<2x1024xf32>
    %28 = arith.maximumf %26, %27 : vector<2x1024xf32>
    %c0_4 = arith.constant 0 : index
    %c0_5 = arith.constant 0 : index
    %29 = vector.load %arg3[%c0_4, %c0_5] : memref<2x1024xf32, #tpu.memory_space<vmem>>, vector<2x1024xf32>
    tpu.vector_store %arg3[%c0_4, %c0_5], %28 {strides = array<i32>} : memref<2x1024xf32, #tpu.memory_space<vmem>>, vector<2x1024xf32>,
    return
  }
  func.func @transform_0(%arg0: i32) -> i32 {
    %c0_i32 = arith.constant 0 : i32
    %c0_i32_0 = arith.constant 0 : i32
    return %c0_i32 : i32
  }
  func.func @transform_1(%arg0: i32) -> (i32, i32) {
    %c0_i32 = arith.constant 0 : i32
    %c0_i32_0 = arith.constant 0 : i32
    return %arg0, %c0_i32 : i32, i32
  }
  func.func @transform_2(%arg0: i32) -> (i32, i32) {
    %c0_i32 = arith.constant 0 : i32
    %c0_i32_0 = arith.constant 0 : i32
    return %arg0, %c0_i32 : i32, i32
  }
}

</mosaic_0001>

<bundles_post_ra>
// kernel: tpu_custom_call.1
= control target key start
LH: loop header
LB: loop body
LE: loop exit
PB: predicated region body
PF: predicated region fallthrough
CT: control target
= control target key end

     0   :  { %7 = vsyncpa [#allocation5], 0  ;;  %s214_s0 = inlined_call_operand.hbm [shape: f32[7], index: 0, kind: input, shape index: {}]   ;;  %s215_s1 = inlined_call_operand.hbm [shape: f32[2,1024], index: 1, kind: input, shape index: {}]   ;;  %s216_s2 = inlined_call_operand.hbm [shape: f32[2,1024], index: 2, kind: output, shape index: {}]  }
   0x1   :  { %8 = vsyncpa [#allocation3], 0 }
   0x2   :  { %9 = vsyncpa [#allocation4], 0  ;;  %s100_s11 = scalar_lea.hbm %s214_s0, 16 }
   0x3   :  { %p101_p0 = scmp.ne.s32.totalorder %s214_s0, %s100_s11  ;;  %p104_p1 = scmp.lt.u32.totalorder %s100_s11, %s214_s0 }
   0x5   :  { %p106_p2 = pnand %p104_p1, %p101_p0 }
   0x7   :  { %109 = shalt.err (!%p106_p2)
}
   0x8   :  { %s160_s16 = smov [#allocation2]   ;;  %s161_s19 = smov [#allocation6]  }
   0x9   :  { %17 = dma.hbm_to_smem %s214_s0, 16, %s160_s16, [#allocation5]  }
   0xa   :  { %s24_s20 = sshll.u32 %s161_s19, 4  ;;  %s110_s23 = scalar_lea.hbm %s215_s1, 256  ;;  %s25_s20 = int_to_ptr.vmem [resolvable:$true] %s24_s20 }
   0xb   :  { %p111_p3 = scmp.ne.s32.totalorder %s215_s1, %s110_s23  ;;  %p114_p4 = scmp.lt.u32.totalorder %s110_s23, %s215_s1 }
   0xd   :  { %p116_p5 = pnand %p114_p4, %p111_p3 }
   0xf   :  { %119 = shalt.err (!%p116_p5)
}
  0x10   :  { %s120_s28 = scalar_lea.vmem %s25_s20, 256  ;;  %p125_p7 = scmp.lt.s32.totalorder %s25_s20, %s25_s20 }
  0x11   :  { %p121_p6 = scmp.ne.s32.totalorder %s25_s20, %s120_s28  ;;  %p126_p8 = scmp.lt.s32.totalorder %s120_s28, %s120_s28 }
  0x13   :  { %p127_p9 = por %p126_p8, %p125_p7 }
  0x15   :  { %p128_p10 = pnand %p127_p9, %p121_p6 }
  0x17   :  { %131 = shalt.err (!%p128_p10)
}
  0x18   :  { %27 = dma.hbm_to_vmem [thread:$0]  %s215_s1, 256, %s25_s20, [#allocation3]  }
  0x19   :  { %154 = dma.done.wait [#allocation5], 16  }
  0x1a   :  { %155 = vsyncadd [#allocation5], 4294967280 }
  0x1b   :  { %156 = dma.done.wait [#allocation3], 256  }
  0x1c   :  { %157 = vsyncadd [#allocation3], 4294967040 }
  0x1d   :  { %34 = sfence }
  0x1e   :  { %s35_s30 = sld [smem:[#allocation2]]  ;;  %s91_s3 = sld [smem:[#allocation2 + $0x1]]  ;;  %v42_v0 = vld [vmem:[#allocation6] sm:$0xff]  ;;  %v43_v1 = vld [vmem:[#allocation6 + $0x8] sm:$0xff] }
  0x1f   :  { %s93_s4 = sld [smem:[#allocation2 + $0x3]]  ;;  %s92_s5 = sld [smem:[#allocation2 + $0x2]] }
  0x20   :  { %s94_s6 = sld [smem:[#allocation2 + $0x4]]  ;;  %s95_s7 = sld [smem:[#allocation2 + $0x5]] }
  0x21   :  { %s96_s8 = sld [smem:[#allocation2 + $0x6]]  ;;  %s162_s1 = smov [#allocation7]  }
  0x22   :  { %s81_s9 = sshll.u32 %s162_s1, 4  ;;  %s82_s9 = int_to_ptr.vmem [resolvable:$true] %s81_s9 }
  0x23   :  { %s132_s10 = scalar_lea.vmem %s82_s9, 256  ;;  %p137_p12 = scmp.lt.s32.totalorder %s82_s9, %s82_s9 }
  0x24   :  { %v44_v2 = vstv %s35_s30  ;;  %v47_v3 = vstv %s91_s3  ;;  %p133_p11 = scmp.ne.s32.totalorder %s82_s9, %s132_s10  ;;  %p138_p13 = scmp.lt.s32.totalorder %s132_s10, %s132_s10 }
  0x25   :  { %v45_v4 = vmul.f32 %v44_v2, %v42_v0  ;;  %v55_v5 = vstv %s93_s4  ;;  %v46_v6 = vmul.f32 %v44_v2, %v43_v1  ;;  %v52_v12 = vstv %s92_s5 }
  0x26   :  { %v56_v7 = vmul.f32 %v55_v5, %v42_v0  ;;  %v58_v8 = vstv %s94_s6  ;;  %v57_v9 = vmul.f32 %v55_v5, %v43_v1  ;;  %v63_v16 = vstv %s95_s7  ;;  %p139_p0 = por %p138_p13, %p137_p12 }
  0x27   :  { %v48_v10 = vadd.f32 %v47_v3, %v45_v4  ;;  %v49_v11 = vadd.f32 %v47_v3, %v46_v6  ;;  %v68_v24 = vstv %s96_s8 }
  0x28   :  { %v59_v13 = vadd.f32 %v58_v8, %v56_v7  ;;  %v60_v14 = vadd.f32 %v58_v8, %v57_v9  ;;  %p140_p1 = pnand %p139_p0, %p133_p11 }
  0x29   :  { %v50_v15 = vmax.f32 %v48_v10, 0.0  ;;  %v51_v17 = vmax.f32 %v49_v11, 0.0 }
  0x2a   :  { %v61_v18 = vmax.f32 %v59_v13, 0.0  ;;  %v62_v19 = vmax.f32 %v60_v14, 0.0 }
  0x2b   :  { %v53_v20 = vmul.f32 %v52_v12, %v50_v15  ;;  %v54_v21 = vmul.f32 %v52_v12, %v51_v17 }
  0x2c   :  { %v64_v22 = vmul.f32 %v63_v16, %v61_v18  ;;  %v65_v23 = vmul.f32 %v63_v16, %v62_v19 }
  0x2e   :  { %v66_v25 = vadd.f32 %v64_v22, %v53_v20  ;;  %v67_v26 = vadd.f32 %v65_v23, %v54_v21 }
  0x30   :  { %v69_v27 = vadd.f32 %v68_v24, %v66_v25  ;;  %v70_v28 = vadd.f32 %v68_v24, %v67_v26 }
  0x32   :  { %v71_v29 = vmax.f32 %v69_v27, 0.0  ;;  %v72_v30 = vmax.f32 %v70_v28, 0.0 }
  0x34   :  { %73 = vst [vmem:[#allocation7] sm:$0xff] %v71_v29  ;;  %74 = vst [vmem:[#allocation7 + $0x8] sm:$0xff] %v72_v30 }
  0x35   :  { %143 = shalt.err (!%p140_p1)
}
  0x36   :  { %s144_s13 = scalar_lea.hbm %s216_s2, 256 }
  0x37   :  { %p145_p2 = scmp.ne.s32.totalorder %s216_s2, %s144_s13  ;;  %p148_p3 = scmp.lt.u32.totalorder %s144_s13, %s216_s2 }
  0x39   :  { %p150_p4 = pnand %p148_p3, %p145_p2 }
  0x3b   :  { %153 = shalt.err (!%p150_p4)
}
  0x3c   :  { %84 = dma.vmem_to_hbm [thread:$0]  %s82_s9, 256, %s216_s2, [#allocation4]  }
  0x3d   :  { %158 = dma.done.wait [#allocation4], 256  }
  0x3e   :  { %159 = vsyncadd [#allocation4], 4294967040 }
  0x3f   :  { %88 = vsyncpa [#allocation3], 1 }
  0x40   :  { %89 = vsyncpa [#allocation4], 1 }
  0x41   :  { %90 = vsyncpa [#allocation5], 1 }

</bundles_post_ra>
